<compile_context>
chip_gen: v7x
topology: tpu7x:2x2x1
jax: 0.10.0
libtpu: 0.0.40
codegen_flags: <defaults>
</compile_context>

<pallas_src>
import functools

import jax
import jax.numpy as jnp
from jax import lax
from jax.experimental import pallas as pl
from jax.experimental.pallas import tpu as pltpu

LANES = 128
MAX_TILE_ROWS = 2048      # (2048, 128) f32 block = 1 MiB; int8 targets block = 256 KiB


def _num_core_splits() -> int:
    """2 on dual-TensorCore chips (v7x), 1 on single-TC v5e/v6e."""
    try:
        kind = jax.devices()[0].device_kind.lower()
    except Exception:  # pragma: no cover - defensive
        return 1
    return 2 if "v7" in kind else 1


def _partial_sums_kernel(p_ref, t_ref, tp_ref, dn_ref, logsum_ref,
                         *, tile_rows, tiles_per_core, valid_rows):
    """Per-core partial sums for dice/BCE.

    Output blocks are (1, 1, 128), resident across the reduction axis:
      tp_ref     += sum(pred_bin * t)
      dn_ref     += sum(pred_bin + t)                       (dice denominator)
      logsum_ref += sum(max(log(t ? p : 1-p), -100))        (negated in wrapper)
    """
    c = pl.program_id(0)          # core-split axis
    s = pl.program_id(1)          # reduction axis ("arbitrary")

    @pl.when(s == 0)
    def _init():
        tp_ref[...] = jnp.zeros_like(tp_ref)
        dn_ref[...] = jnp.zeros_like(dn_ref)
        logsum_ref[...] = jnp.zeros_like(logsum_ref)

    p = p_ref[...].astype(jnp.float32)
    t = t_ref[...].astype(jnp.float32)

    def _vreg_sum(x):
        # (tile_rows, 128) -> (1, 1, 128).  The reshape keeps every (8, 128)
        # vreg intact, so the axis-0 sum is pure vreg-to-vreg VALU adds; the
        # final sublane reduce touches one vreg and lands on the (free) XLU slot.
        if tile_rows % 8 == 0:
            x = jnp.sum(x.reshape(tile_rows // 8, 8, LANES), axis=0)
        return jnp.sum(x, axis=0, keepdims=True)[None]

    def _accumulate(valid):
        p_bin = (p >= 0.5).astype(jnp.float32)
        tp_term = p_bin * t
        dn_term = p_bin + t
        # Binary {0,1} targets: -(t*log p + (1-t)*log(1-p)) == -log(t ? p : 1-p).
        # Accumulate +log (clamped at -100 like PyTorch BCELoss); the negation
        # distributes over the sum and is applied once in the wrapper.
        log_term = jnp.maximum(jnp.log(jnp.where(t >= 0.5, p, 1.0 - p)), -100.0)
        if valid is not None:
            # jnp.where is a select, so NaN/Inf from log() on garbage rows of a
            # partial/clamped block is discarded.
            tp_term = jnp.where(valid, tp_term, 0.0)
            dn_term = jnp.where(valid, dn_term, 0.0)
            log_term = jnp.where(valid, log_term, 0.0)
        tp_ref[...] += _vreg_sum(tp_term)
        dn_ref[...] += _vreg_sum(dn_term)
        logsum_ref[...] += _vreg_sum(log_term)

    g = c * tiles_per_core + s                  # logical (unclamped) tile index
    needs_mask = (g + 1) * tile_rows > valid_rows

    # Fast path: interior tiles are fully valid -> no iota / mask / selects.
    @pl.when(jnp.logical_not(needs_mask))
    def _interior():
        _accumulate(None)

    # Edge path: partial last tile and any duplicated (index-clamped) tile.
    @pl.when(needs_mask)
    def _edge():
        row_ids = g * tile_rows + lax.broadcasted_iota(
            jnp.int32, (tile_rows, LANES), 0)
        _accumulate(row_ids < valid_rows)


def binary_weighted_dice_bce_loss(preds, targets, weight: float = 0.25):
    """Pallas implementation of BinaryWeightedDiceBCELoss.forward.

    NOTE: the single-log BCE form is exact only for hard {0,1} targets (which
    torchmetrics.dice requires of `targets` anyway).
    """
    n_elems = preds.size
    p_flat = preds.reshape(-1)
    t_flat = targets.reshape(-1)
    if t_flat.dtype == jnp.bool_:
        t_flat = t_flat.astype(jnp.int8)     # keep targets at 1 B/elem in HBM

    rows = n_elems // LANES
    rem = n_elems - rows * LANES

    tp = jnp.float32(0.0)
    dn = jnp.float32(0.0)
    log_sum = jnp.float32(0.0)

    if rows > 0:
        if rem == 0:
            # Identity reshape: no HBM copy.
            p2 = p_flat.reshape(rows, LANES)
            t2 = t_flat.reshape(rows, LANES)
        else:
            # TODO(synk): for n_elems % 128 != 0 these slices materialize a
            # near-full-size HBM copy before the kernel; handle the tail with an
            # element-level in-kernel mask if non-multiple-of-128 inputs ever
            # matter for performance.
            p2 = p_flat[: rows * LANES].reshape(rows, LANES)
            t2 = t_flat[: rows * LANES].reshape(rows, LANES)

        # tile_rows is either the full row count (always a legal block) or the
        # large fixed tile (multiple of 8 and 32, so f32 and int8 tiling both ok).
        tile_rows = MAX_TILE_ROWS if rows >= MAX_TILE_ROWS else rows
        total_tiles = pl.cdiv(rows, tile_rows)
        ncores = min(_num_core_splits(), total_tiles)
        tiles_per_core = pl.cdiv(total_tiles, ncores)

        def in_map(c, s):
            # Clamp so the DMA source block stays inside the array; duplicated
            # blocks are zeroed by the in-kernel edge mask.
            return (jnp.minimum(c * tiles_per_core + s, total_tiles - 1), 0)

        kernel = functools.partial(
            _partial_sums_kernel,
            tile_rows=tile_rows,
            tiles_per_core=tiles_per_core,
            valid_rows=rows,
        )

        out_sds = jax.ShapeDtypeStruct((ncores, 1, LANES), jnp.float32)
        out_spec = pl.BlockSpec((1, 1, LANES), lambda c, s: (c, 0, 0))

        if ncores > 1:
            # Real megacore split on dual-TC chips (v7x).
            dim_sem = (pltpu.CORE_PARALLEL, pltpu.ARBITRARY)
        else:
            dim_sem = ("arbitrary", "arbitrary")

        tp_p, dn_p, log_p = pl.pallas_call(
            kernel,
            out_shape=(out_sds, out_sds, out_sds),
            grid_spec=pltpu.PrefetchScalarGridSpec(
                num_scalar_prefetch=0,
                grid=(ncores, tiles_per_core),
                in_specs=[
                    pl.BlockSpec((tile_rows, LANES), in_map),
                    pl.BlockSpec((tile_rows, LANES), in_map),
                ],
                out_specs=(out_spec, out_spec, out_spec),
            ),
            compiler_params=pltpu.CompilerParams(dimension_semantics=dim_sem),
        )(p2, t2)

        tp += jnp.sum(tp_p)
        dn += jnp.sum(dn_p)
        log_sum += jnp.sum(log_p)

    if rem > 0:
        # <128-element tail handled in plain JAX (same single-log binary form).
        p_t = p_flat[rows * LANES:].astype(jnp.float32)
        t_t = t_flat[rows * LANES:].astype(jnp.float32)
        pb = (p_t >= 0.5).astype(jnp.float32)
        tp += jnp.sum(pb * t_t)
        dn += jnp.sum(pb) + jnp.sum(t_t)
        log_sum += jnp.sum(
            jnp.maximum(jnp.log(jnp.where(t_t >= 0.5, p_t, 1.0 - p_t)), -100.0))

    dice = jnp.where(dn > 0.0, 2.0 * tp / dn, 0.0)   # zero_division=0
    bce = -log_sum / jnp.float32(n_elems)            # negate the clamped-log sum once
    return weight * (1.0 - dice) + (1.0 - weight) * bce


def _reference_loss(preds, targets, weight: float = 0.25):
    """Pure-JAX reference mirroring the PyTorch module semantics."""
    p = preds.astype(jnp.float32).reshape(-1)
    t = targets.astype(jnp.float32).reshape(-1)
    p_bin = (p >= 0.5).astype(jnp.float32)
    tp = jnp.sum(p_bin * t)
    denom = jnp.sum(p_bin) + jnp.sum(t)
    dice = jnp.where(denom > 0.0, 2.0 * tp / denom, 0.0)
    bce = jnp.mean(
        -(t * jnp.maximum(jnp.log(p), -100.0)
          + (1.0 - t) * jnp.maximum(jnp.log(1.0 - p), -100.0)))
    return weight * (1.0 - dice) + (1.0 - weight) * bce


if __name__ == "__main__":
    key = jax.random.PRNGKey(0)
    k_p, k_t = jax.random.split(key)

    # Small segmentation-like shapes: NCHW probabilities and binary int8 masks.
    shape = (2, 4, 16, 16)
    preds = jax.random.uniform(k_p, shape, dtype=jnp.float32,
                               minval=1e-4, maxval=1.0 - 1e-4)
    targets = jax.random.bernoulli(k_t, 0.3, shape).astype(jnp.int8)

    loss_fn = jax.jit(functools.partial(binary_weighted_dice_bce_loss, weight=0.25))
    loss = jax.block_until_ready(loss_fn(preds, targets))

    ref = jax.block_until_ready(_reference_loss(preds, targets, weight=0.25))
    assert jnp.allclose(loss, ref, rtol=1e-5, atol=1e-5), (loss, ref)

    print("KERNEL_OK")
</pallas_src>

<mosaic_0001>
module attributes {stable_mosaic.version = 11 : i64} {
  func.func @_partial_sums_kernel(%arg0: i32, %arg1: i32, %arg2: memref<16x128xf32, #tpu.memory_space<vmem>>, %arg3: memref<16x128xi8, #tpu.memory_space<vmem>>, %arg4: memref<1x1x128xf32, #tpu.memory_space<vmem>>, %arg5: memref<1x1x128xf32, #tpu.memory_space<vmem>>, %arg6: memref<1x1x128xf32, #tpu.memory_space<vmem>>) attributes {dimension_semantics = [#tpu.dimension_semantics<arbitrary>, #tpu.dimension_semantics<arbitrary>], iteration_bounds = array<i64: 1, 1>, scalar_prefetch = 0 : i64, scratch_operands = 0 : i64, tpu.core_type = #tpu.core_type<tc>, window_params = [{transform_indices = @transform_0, window_bounds = array<i64: 16, 128>}, {transform_indices = @transform_1, window_bounds = array<i64: 16, 128>}, {transform_indices = @transform_2, window_bounds = array<i64: 1, 1, 128>}, {transform_indices = @transform_3, window_bounds = array<i64: 1, 1, 128>}, {transform_indices = @transform_4, window_bounds = array<i64: 1, 1, 128>}]} {
    %c0_i32 = arith.constant 0 : i32
    %0 = arith.cmpi eq, %arg1, %c0_i32 : i32
    %1 = arith.extui %0 : i1 to i32
    %c0_i32_0 = arith.constant 0 : i32
    %2 = arith.cmpi ne, %1, %c0_i32_0 : i32
    scf.if %2 {
      %cst = arith.constant 0.000000e+00 : f32
      %16 = vector.broadcast %cst : f32 to vector<1x1x128xf32>
      %c0_8 = arith.constant 0 : index
      %c0_9 = arith.constant 0 : index
      %c0_10 = arith.constant 0 : index
      %17 = vector.load %arg4[%c0_8, %c0_9, %c0_10] : memref<1x1x128xf32, #tpu.memory_space<vmem>>, vector<1x1x128xf32>
      tpu.vector_store %arg4[%c0_8, %c0_9, %c0_10], %16 {strides = array<i32>} : memref<1x1x128xf32, #tpu.memory_space<vmem>>, vector<1x1x128xf32>,
      %cst_11 = arith.constant 0.000000e+00 : f32
      %18 = vector.broadcast %cst_11 : f32 to vector<1x1x128xf32>
      %c0_12 = arith.constant 0 : index
      %c0_13 = arith.constant 0 : index
      %c0_14 = arith.constant 0 : index
      %19 = vector.load %arg5[%c0_12, %c0_13, %c0_14] : memref<1x1x128xf32, #tpu.memory_space<vmem>>, vector<1x1x128xf32>
      tpu.vector_store %arg5[%c0_12, %c0_13, %c0_14], %18 {strides = array<i32>} : memref<1x1x128xf32, #tpu.memory_space<vmem>>, vector<1x1x128xf32>,
      %cst_15 = arith.constant 0.000000e+00 : f32
      %20 = vector.broadcast %cst_15 : f32 to vector<1x1x128xf32>
      %c0_16 = arith.constant 0 : index
      %c0_17 = arith.constant 0 : index
      %c0_18 = arith.constant 0 : index
      %21 = vector.load %arg6[%c0_16, %c0_17, %c0_18] : memref<1x1x128xf32, #tpu.memory_space<vmem>>, vector<1x1x128xf32>
      tpu.vector_store %arg6[%c0_16, %c0_17, %c0_18], %20 {strides = array<i32>} : memref<1x1x128xf32, #tpu.memory_space<vmem>>, vector<1x1x128xf32>,
    } else {
    }
    %c0 = arith.constant 0 : index
    %c0_1 = arith.constant 0 : index
    %3 = vector.load %arg2[%c0, %c0_1] : memref<16x128xf32, #tpu.memory_space<vmem>>, vector<16x128xf32>
    %c0_2 = arith.constant 0 : index
    %c0_3 = arith.constant 0 : index
    %4 = vector.load %arg3[%c0_2, %c0_3] : memref<16x128xi8, #tpu.memory_space<vmem>>, vector<16x128xi8>
    %5 = arith.sitofp %4 : vector<16x128xi8> to vector<16x128xf32>
    %c1_i32 = arith.constant 1 : i32
    %6 = arith.muli %arg0, %c1_i32 : i32
    %7 = arith.addi %6, %arg1 : i32
    %c1_i32_4 = arith.constant 1 : i32
    %8 = arith.addi %7, %c1_i32_4 : i32
    %c16_i32 = arith.constant 16 : i32
    %9 = arith.muli %8, %c16_i32 : i32
    %c16_i32_5 = arith.constant 16 : i32
    %10 = arith.cmpi sgt, %9, %c16_i32_5 : i32
    %true = arith.constant true
    %11 = arith.xori %10, %true : i1
    %12 = arith.extui %11 : i1 to i32
    %c0_i32_6 = arith.constant 0 : i32
    %13 = arith.cmpi ne, %12, %c0_i32_6 : i32
    scf.if %13 {
      %cst = arith.constant 5.000000e-01 : f32
      %16 = vector.broadcast %cst : f32 to vector<16x128xf32>
      %17 = arith.cmpf oge, %3, %16 : vector<16x128xf32>
      %18 = arith.extui %17 : vector<16x128xi1> to vector<16x128xi32>
      %19 = arith.sitofp %18 : vector<16x128xi32> to vector<16x128xf32>
      %20 = arith.mulf %19, %5 : vector<16x128xf32>
      %21 = arith.addf %19, %5 : vector<16x128xf32>
      %cst_8 = arith.constant 5.000000e-01 : f32
      %22 = vector.broadcast %cst_8 : f32 to vector<16x128xf32>
      %23 = arith.cmpf oge, %5, %22 : vector<16x128xf32>
      %cst_9 = arith.constant 1.000000e+00 : f32
      %24 = vector.broadcast %cst_9 : f32 to vector<16x128xf32>
      %25 = arith.subf %24, %3 : vector<16x128xf32>
      %26 = arith.select %23, %3, %25 : vector<16x128xi1>, vector<16x128xf32>
      %27 = math.log %26 : vector<16x128xf32>
      %cst_10 = arith.constant -1.000000e+02 : f32
      %28 = vector.broadcast %cst_10 : f32 to vector<16x128xf32>
      %29 = arith.maximumf %27, %28 : vector<16x128xf32>
      %c0_11 = arith.constant 0 : index
      %c0_12 = arith.constant 0 : index
      %c0_13 = arith.constant 0 : index
      %30 = vector.load %arg4[%c0_11, %c0_12, %c0_13] : memref<1x1x128xf32, #tpu.memory_space<vmem>>, vector<1x1x128xf32>
      %31 = vector.shape_cast %20 : vector<16x128xf32> to vector<2x8x128xf32>
      %cst_14 = arith.constant dense<0.000000e+00> : vector<8x128xf32>
      %32 = vector.multi_reduction <add>, %31, %cst_14 [0] : vector<2x8x128xf32> to vector<8x128xf32>
      %cst_15 = arith.constant dense<0.000000e+00> : vector<128xf32>
      %33 = vector.multi_reduction <add>, %32, %cst_15 [0] : vector<8x128xf32> to vector<128xf32>
      %34 = vector.shape_cast %33 : vector<128xf32> to vector<1x128xf32>
      %35 = vector.shape_cast %34 : vector<1x128xf32> to vector<1x1x128xf32>
      %36 = arith.addf %30, %35 : vector<1x1x128xf32>
      %c0_16 = arith.constant 0 : index
      %c0_17 = arith.constant 0 : index
      %c0_18 = arith.constant 0 : index
      %37 = vector.load %arg4[%c0_16, %c0_17, %c0_18] : memref<1x1x128xf32, #tpu.memory_space<vmem>>, vector<1x1x128xf32>
      tpu.vector_store %arg4[%c0_16, %c0_17, %c0_18], %36 {strides = array<i32>} : memref<1x1x128xf32, #tpu.memory_space<vmem>>, vector<1x1x128xf32>,
      %c0_19 = arith.constant 0 : index
      %c0_20 = arith.constant 0 : index
      %c0_21 = arith.constant 0 : index
      %38 = vector.load %arg5[%c0_19, %c0_20, %c0_21] : memref<1x1x128xf32, #tpu.memory_space<vmem>>, vector<1x1x128xf32>
      %39 = vector.shape_cast %21 : vector<16x128xf32> to vector<2x8x128xf32>
      %cst_22 = arith.constant dense<0.000000e+00> : vector<8x128xf32>
      %40 = vector.multi_reduction <add>, %39, %cst_22 [0] : vector<2x8x128xf32> to vector<8x128xf32>
      %cst_23 = arith.constant dense<0.000000e+00> : vector<128xf32>
      %41 = vector.multi_reduction <add>, %40, %cst_23 [0] : vector<8x128xf32> to vector<128xf32>
      %42 = vector.shape_cast %41 : vector<128xf32> to vector<1x128xf32>
      %43 = vector.shape_cast %42 : vector<1x128xf32> to vector<1x1x128xf32>
      %44 = arith.addf %38, %43 : vector<1x1x128xf32>
      %c0_24 = arith.constant 0 : index
      %c0_25 = arith.constant 0 : index
      %c0_26 = arith.constant 0 : index
      %45 = vector.load %arg5[%c0_24, %c0_25, %c0_26] : memref<1x1x128xf32, #tpu.memory_space<vmem>>, vector<1x1x128xf32>
      tpu.vector_store %arg5[%c0_24, %c0_25, %c0_26], %44 {strides = array<i32>} : memref<1x1x128xf32, #tpu.memory_space<vmem>>, vector<1x1x128xf32>,
      %c0_27 = arith.constant 0 : index
      %c0_28 = arith.constant 0 : index
      %c0_29 = arith.constant 0 : index
      %46 = vector.load %arg6[%c0_27, %c0_28, %c0_29] : memref<1x1x128xf32, #tpu.memory_space<vmem>>, vector<1x1x128xf32>
      %47 = vector.shape_cast %29 : vector<16x128xf32> to vector<2x8x128xf32>
      %cst_30 = arith.constant dense<0.000000e+00> : vector<8x128xf32>
      %48 = vector.multi_reduction <add>, %47, %cst_30 [0] : vector<2x8x128xf32> to vector<8x128xf32>
      %cst_31 = arith.constant dense<0.000000e+00> : vector<128xf32>
      %49 = vector.multi_reduction <add>, %48, %cst_31 [0] : vector<8x128xf32> to vector<128xf32>
      %50 = vector.shape_cast %49 : vector<128xf32> to vector<1x128xf32>
      %51 = vector.shape_cast %50 : vector<1x128xf32> to vector<1x1x128xf32>
      %52 = arith.addf %46, %51 : vector<1x1x128xf32>
      %c0_32 = arith.constant 0 : index
      %c0_33 = arith.constant 0 : index
      %c0_34 = arith.constant 0 : index
      %53 = vector.load %arg6[%c0_32, %c0_33, %c0_34] : memref<1x1x128xf32, #tpu.memory_space<vmem>>, vector<1x1x128xf32>
      tpu.vector_store %arg6[%c0_32, %c0_33, %c0_34], %52 {strides = array<i32>} : memref<1x1x128xf32, #tpu.memory_space<vmem>>, vector<1x1x128xf32>,
    } else {
    }
    %14 = arith.extui %10 : i1 to i32
    %c0_i32_7 = arith.constant 0 : i32
    %15 = arith.cmpi ne, %14, %c0_i32_7 : i32
    scf.if %15 {
      %c16_i32_8 = arith.constant 16 : i32
      %16 = arith.muli %7, %c16_i32_8 : i32
      %17 = tpu.iota {dimensions = array<i32: 0>} : vector<16x128xi32>
      %18 = vector.broadcast %16 : i32 to vector<16x128xi32>
      %19 = arith.addi %18, %17 : vector<16x128xi32>
      %c16_i32_9 = arith.constant 16 : i32
      %20 = vector.broadcast %c16_i32_9 : i32 to vector<16x128xi32>
      %21 = arith.cmpi slt, %19, %20 : vector<16x128xi32>
      %cst = arith.constant 5.000000e-01 : f32
      %22 = vector.broadcast %cst : f32 to vector<16x128xf32>
      %23 = arith.cmpf oge, %3, %22 : vector<16x128xf32>
      %24 = arith.extui %23 : vector<16x128xi1> to vector<16x128xi32>
      %25 = arith.sitofp %24 : vector<16x128xi32> to vector<16x128xf32>
      %26 = arith.mulf %25, %5 : vector<16x128xf32>
      %27 = arith.addf %25, %5 : vector<16x128xf32>
      %cst_10 = arith.constant 5.000000e-01 : f32
      %28 = vector.broadcast %cst_10 : f32 to vector<16x128xf32>
      %29 = arith.cmpf oge, %5, %28 : vector<16x128xf32>
      %cst_11 = arith.constant 1.000000e+00 : f32
      %30 = vector.broadcast %cst_11 : f32 to vector<16x128xf32>
      %31 = arith.subf %30, %3 : vector<16x128xf32>
      %32 = arith.select %29, %3, %31 : vector<16x128xi1>, vector<16x128xf32>
      %33 = math.log %32 : vector<16x128xf32>
      %cst_12 = arith.constant -1.000000e+02 : f32
      %34 = vector.broadcast %cst_12 : f32 to vector<16x128xf32>
      %35 = arith.maximumf %33, %34 : vector<16x128xf32>
      %cst_13 = arith.constant 0.000000e+00 : f32
      %36 = vector.broadcast %cst_13 : f32 to vector<16x128xf32>
      %37 = arith.select %21, %26, %36 : vector<16x128xi1>, vector<16x128xf32>
      %cst_14 = arith.constant 0.000000e+00 : f32
      %38 = vector.broadcast %cst_14 : f32 to vector<16x128xf32>
      %39 = arith.select %21, %27, %38 : vector<16x128xi1>, vector<16x128xf32>
      %cst_15 = arith.constant 0.000000e+00 : f32
      %40 = vector.broadcast %cst_15 : f32 to vector<16x128xf32>
      %41 = arith.select %21, %35, %40 : vector<16x128xi1>, vector<16x128xf32>
      %c0_16 = arith.constant 0 : index
      %c0_17 = arith.constant 0 : index
      %c0_18 = arith.constant 0 : index
      %42 = vector.load %arg4[%c0_16, %c0_17, %c0_18] : memref<1x1x128xf32, #tpu.memory_space<vmem>>, vector<1x1x128xf32>
      %43 = vector.shape_cast %37 : vector<16x128xf32> to vector<2x8x128xf32>
      %cst_19 = arith.constant dense<0.000000e+00> : vector<8x128xf32>
      %44 = vector.multi_reduction <add>, %43, %cst_19 [0] : vector<2x8x128xf32> to vector<8x128xf32>
      %cst_20 = arith.constant dense<0.000000e+00> : vector<128xf32>
      %45 = vector.multi_reduction <add>, %44, %cst_20 [0] : vector<8x128xf32> to vector<128xf32>
      %46 = vector.shape_cast %45 : vector<128xf32> to vector<1x128xf32>
      %47 = vector.shape_cast %46 : vector<1x128xf32> to vector<1x1x128xf32>
      %48 = arith.addf %42, %47 : vector<1x1x128xf32>
      %c0_21 = arith.constant 0 : index
      %c0_22 = arith.constant 0 : index
      %c0_23 = arith.constant 0 : index
      %49 = vector.load %arg4[%c0_21, %c0_22, %c0_23] : memref<1x1x128xf32, #tpu.memory_space<vmem>>, vector<1x1x128xf32>
      tpu.vector_store %arg4[%c0_21, %c0_22, %c0_23], %48 {strides = array<i32>} : memref<1x1x128xf32, #tpu.memory_space<vmem>>, vector<1x1x128xf32>,
      %c0_24 = arith.constant 0 : index
      %c0_25 = arith.constant 0 : index
      %c0_26 = arith.constant 0 : index
      %50 = vector.load %arg5[%c0_24, %c0_25, %c0_26] : memref<1x1x128xf32, #tpu.memory_space<vmem>>, vector<1x1x128xf32>
      %51 = vector.shape_cast %39 : vector<16x128xf32> to vector<2x8x128xf32>
      %cst_27 = arith.constant dense<0.000000e+00> : vector<8x128xf32>
      %52 = vector.multi_reduction <add>, %51, %cst_27 [0] : vector<2x8x128xf32> to vector<8x128xf32>
      %cst_28 = arith.constant dense<0.000000e+00> : vector<128xf32>
      %53 = vector.multi_reduction <add>, %52, %cst_28 [0] : vector<8x128xf32> to vector<128xf32>
      %54 = vector.shape_cast %53 : vector<128xf32> to vector<1x128xf32>
      %55 = vector.shape_cast %54 : vector<1x128xf32> to vector<1x1x128xf32>
      %56 = arith.addf %50, %55 : vector<1x1x128xf32>
      %c0_29 = arith.constant 0 : index
      %c0_30 = arith.constant 0 : index
      %c0_31 = arith.constant 0 : index
      %57 = vector.load %arg5[%c0_29, %c0_30, %c0_31] : memref<1x1x128xf32, #tpu.memory_space<vmem>>, vector<1x1x128xf32>
      tpu.vector_store %arg5[%c0_29, %c0_30, %c0_31], %56 {strides = array<i32>} : memref<1x1x128xf32, #tpu.memory_space<vmem>>, vector<1x1x128xf32>,
      %c0_32 = arith.constant 0 : index
      %c0_33 = arith.constant 0 : index
      %c0_34 = arith.constant 0 : index
      %58 = vector.load %arg6[%c0_32, %c0_33, %c0_34] : memref<1x1x128xf32, #tpu.memory_space<vmem>>, vector<1x1x128xf32>
      %59 = vector.shape_cast %41 : vector<16x128xf32> to vector<2x8x128xf32>
      %cst_35 = arith.constant dense<0.000000e+00> : vector<8x128xf32>
      %60 = vector.multi_reduction <add>, %59, %cst_35 [0] : vector<2x8x128xf32> to vector<8x128xf32>
      %cst_36 = arith.constant dense<0.000000e+00> : vector<128xf32>
      %61 = vector.multi_reduction <add>, %60, %cst_36 [0] : vector<8x128xf32> to vector<128xf32>
      %62 = vector.shape_cast %61 : vector<128xf32> to vector<1x128xf32>
      %63 = vector.shape_cast %62 : vector<1x128xf32> to vector<1x1x128xf32>
      %64 = arith.addf %58, %63 : vector<1x1x128xf32>
      %c0_37 = arith.constant 0 : index
      %c0_38 = arith.constant 0 : index
      %c0_39 = arith.constant 0 : index
      %65 = vector.load %arg6[%c0_37, %c0_38, %c0_39] : memref<1x1x128xf32, #tpu.memory_space<vmem>>, vector<1x1x128xf32>
      tpu.vector_store %arg6[%c0_37, %c0_38, %c0_39], %64 {strides = array<i32>} : memref<1x1x128xf32, #tpu.memory_space<vmem>>, vector<1x1x128xf32>,
    } else {
    }
    return
  }
  func.func @transform_0(%arg0: i32, %arg1: i32) -> (i32, i32) {
    %c1_i32 = arith.constant 1 : i32
    %0 = arith.muli %arg0, %c1_i32 : i32
    %1 = arith.addi %0, %arg1 : i32
    %c0_i32 = arith.constant 0 : i32
    %2 = arith.minsi %1, %c0_i32 : i32
    %c0_i32_0 = arith.constant 0 : i32
    %c0_i32_1 = arith.constant 0 : i32
    return %2, %c0_i32_0 : i32, i32
  }
  func.func @transform_1(%arg0: i32, %arg1: i32) -> (i32, i32) {
    %c1_i32 = arith.constant 1 : i32
    %0 = arith.muli %arg0, %c1_i32 : i32
    %1 = arith.addi %0, %arg1 : i32
    %c0_i32 = arith.constant 0 : i32
    %2 = arith.minsi %1, %c0_i32 : i32
    %c0_i32_0 = arith.constant 0 : i32
    %c0_i32_1 = arith.constant 0 : i32
    return %2, %c0_i32_0 : i32, i32
  }
  func.func @transform_2(%arg0: i32, %arg1: i32) -> (i32, i32, i32) {
    %c0_i32 = arith.constant 0 : i32
    %c0_i32_0 = arith.constant 0 : i32
    %c0_i32_1 = arith.constant 0 : i32
    return %arg0, %c0_i32, %c0_i32_0 : i32, i32, i32
  }
  func.func @transform_3(%arg0: i32, %arg1: i32) -> (i32, i32, i32) {
    %c0_i32 = arith.constant 0 : i32
    %c0_i32_0 = arith.constant 0 : i32
    %c0_i32_1 = arith.constant 0 : i32
    return %arg0, %c0_i32, %c0_i32_0 : i32, i32, i32
  }
  func.func @transform_4(%arg0: i32, %arg1: i32) -> (i32, i32, i32) {
    %c0_i32 = arith.constant 0 : i32
    %c0_i32_0 = arith.constant 0 : i32
    %c0_i32_1 = arith.constant 0 : i32
    return %arg0, %c0_i32, %c0_i32_0 : i32, i32, i32
  }
}

</mosaic_0001>

<bundles_post_ra>
// kernel: binary_weighted_dice_bce_loss.1
= control target key start
LH: loop header
LB: loop body
LE: loop exit
PB: predicated region body
PF: predicated region fallthrough
CT: control target
= control target key end

     0   :  { %v260_v0 = vmov 0.0   ;;  %s322_s0 = inlined_call_operand.vmem [shape: f32[16,128], index: 0, kind: input, shape index: {}]   ;;  %s323_s1 = inlined_call_operand.vmem [shape: s8[16,128], index: 1, kind: input, shape index: {}]   ;;  %s324_s2 = inlined_call_operand.vmem [shape: f32[1,1,128], index: 2, kind: output, shape index: {0}]   ;;  %s325_s3 = inlined_call_operand.vmem [shape: f32[1,1,128], index: 3, kind: output, shape index: {1}]   ;;  %s326_s4 = inlined_call_operand.vmem [shape: f32[1,1,128], index: 4, kind: output, shape index: {2}]  }
   0x1   :  { %82 = vst [vmem:[%s324_s2] sm:$0x1] %v260_v0  ;;  %v85_v1 = vld [vmem:[%s322_s0] sm:$0xff]  ;;  %v86_v2 = vld [vmem:[%s322_s0 + $0x8] sm:$0xff]  ;;  %83 = vst [vmem:[%s325_s3] sm:$0x1] %v260_v0 }
   0x2   :  { %v252_v3 = vld [vmem:[%s323_s1] sm:$0xf]   ;;  %84 = vst [vmem:[%s326_s4] sm:$0x1] %v260_v0  ;;  %vm101_vm0 = vcmp.ge.f32.partialorder %v85_v1, 0.5  ;;  %vm102_vm1 = vcmp.ge.f32.partialorder %v86_v2, 0.5  ;;  %v113_v10 = vsub.f32 1.0, %v85_v1 }
   0x3   :  { %v253_v4 = vunpack.c.0.s8 %v252_v3  ;;  %v254_v5 = vunpack.c.1.s8 %v252_v3  ;;  %v247_v6 = vsel %vm101_vm0, 1.0, %v260_v0  ;;  %v248_v7 = vsel %vm102_vm1, 1.0, %v260_v0 }
   0x4   :  { %v114_v11 = vsub.f32 1.0, %v86_v2 }
   0x5   :  { %v91_v8 = vcvt.s32.f32 %v253_v4  ;;  %v92_v9 = vcvt.s32.f32 %v254_v5 }
   0x7   :  { %v107_v12 = vmul.f32 %v247_v6, %v91_v8  ;;  %v108_v13 = vmul.f32 %v248_v7, %v92_v9  ;;  %v109_v14 = vadd.f32 %v247_v6, %v91_v8  ;;  %v110_v15 = vadd.f32 %v248_v7, %v92_v9 }
   0x8   :  { %vm111_vm2 = vcmp.ge.f32.partialorder %v91_v8, 0.5  ;;  %vm112_vm3 = vcmp.ge.f32.partialorder %v92_v9, 0.5  ;;  %v123_v31 = vld [vmem:[%s324_s2] sm:$0x1] }
   0x9   :  { %v115_v16 = vsel %vm111_vm2, %v85_v1, %v113_v10  ;;  %v116_v17 = vsel %vm112_vm3, %v86_v2, %v114_v11  ;;  %v124_v18 = vadd.f32 %v108_v13, %v107_v12  ;;  %v134_v19 = vadd.f32 %v110_v15, %v109_v14  ;;  %v133_v32 = vld [vmem:[%s325_s3] sm:$0x1] }
   0xa   :  { %256 = vlog2.f32 %v115_v16  ;;  %v143_v48 = vld [vmem:[%s326_s4] sm:$0x1] }
   0xb   :  { %v125_v20 = vrot.slane %v124_v18, 4  ;;  %v135_v21 = vrot.slane %v134_v19, 4  ;;  %258 = vlog2.f32 %v116_v17 }
   0xd   :  { %v126_v22 = vadd.f32 %v125_v20, %v124_v18  ;;  %v136_v23 = vadd.f32 %v135_v21, %v134_v19 }
   0xf   :  { %v127_v24 = vrot.slane %v126_v22, 2  ;;  %v137_v25 = vrot.slane %v136_v23, 2 }
  0x11   :  { %v128_v26 = vadd.f32 %v127_v24, %v126_v22  ;;  %v138_v27 = vadd.f32 %v137_v25, %v136_v23 }
  0x13   :  { %v129_v28 = vrot.slane %v128_v26, 1  ;;  %v139_v29 = vrot.slane %v138_v27, 1 }
  0x14   :  { %v257_v30 = vpop.eup %256 }
  0x15   :  { %v259_v33 = vpop.eup %258  ;;  %v130_v34 = vadd.f32 %v129_v28, %v128_v26  ;;  %v140_v35 = vadd.f32 %v139_v29, %v138_v27  ;;  %v118_v36 = vmul.f32 0.6931472, %v257_v30 }
  0x16   :  { %v120_v37 = vmul.f32 0.6931472, %v259_v33 }
  0x17   :  { %v131_v38 = vadd.f32 %v130_v34, %v123_v31  ;;  %v141_v39 = vadd.f32 %v140_v35, %v133_v32  ;;  %v121_v40 = vmax.f32 %v118_v36, -100.0 }
  0x18   :  { %v122_v41 = vmax.f32 %v120_v37, -100.0 }
  0x19   :  { %132 = vst [vmem:[%s324_s2] sm:$0x1] %v131_v38  ;;  %142 = vst [vmem:[%s325_s3] sm:$0x1] %v141_v39 }
  0x1a   :  { %v144_v42 = vadd.f32 %v122_v41, %v121_v40 }
  0x1c   :  { %v145_v43 = vrot.slane %v144_v42, 4 }
  0x1e   :  { %v146_v44 = vadd.f32 %v145_v43, %v144_v42 }
  0x20   :  { %v147_v45 = vrot.slane %v146_v44, 2 }
  0x22   :  { %v148_v46 = vadd.f32 %v147_v45, %v146_v44 }
  0x24   :  { %v149_v47 = vrot.slane %v148_v46, 1 }
  0x26   :  { %v150_v49 = vadd.f32 %v149_v47, %v148_v46 }
  0x28   :  { %v151_v50 = vadd.f32 %v150_v49, %v143_v48 }
  0x2a   :  { %152 = vst [vmem:[%s326_s4] sm:$0x1] %v151_v50 }

</bundles_post_ra>
